<compile_context>
chip_gen: v5e
topology: v5e:2x2
jax: 0.10.0
libtpu: 0.0.40
codegen_flags: <defaults>
</compile_context>

<pallas_src>
import functools

import jax
import jax.numpy as jnp
from jax.experimental import pallas as pl
from jax.experimental.pallas import tpu as pltpu

_EPS = 1e-20


def _gumbel_softmax_kernel(logits_ref, noise_ref, out_ref, *, temperature, hard):
    logits = logits_ref[...].astype(jnp.float32)          # (TR, N)
    u = noise_ref[...].astype(jnp.float32)                # U ~ [0, 1)
    shape = logits.shape

    # gumbel noise
    g = -jnp.log(-jnp.log(u + _EPS) + _EPS)

    # softmax((logits + g) / T) along the last axis (numerically stabilized)
    y = (logits + g) * jnp.float32(1.0 / temperature)
    m = jnp.max(y, axis=-1, keepdims=True)
    e = jnp.exp(y - m)
    denom = jnp.sum(e, axis=-1, keepdims=True)
    # per-row reciprocal (TR, 1) + broadcast multiply instead of per-element divide
    y_soft = e * (jnp.float32(1.0) / denom)

    if hard:
        # first-argmax one-hot (matches torch .max(-1) tie behavior: first index).
        # Reuse m (max of y) — argmax is invariant under exp / positive scaling,
        # saving a second cross-lane reduction.
        col = jax.lax.broadcasted_iota(jnp.int32, shape, len(shape) - 1)
        big = jnp.int32(shape[-1])
        first_idx = jnp.min(jnp.where(y == m, col, big), axis=-1, keepdims=True)
        y_hard = (col == first_idx).astype(jnp.float32)
        # straight-through forward value: y_hard - y_soft.detach() + y_soft
        ret = (y_hard - y_soft) + y_soft
    else:
        ret = y_soft

    out_ref[...] = ret.astype(out_ref.dtype)


def _choose_block_rows(r, n, out_dtype):
    """Pick a row-tile size from a conservative VMEM budget (safe v5e/v6e/v7x)."""
    out_bytes = jnp.dtype(out_dtype).itemsize
    # double-buffered logits + noise + output tiles, plus ~6 live (tr, n) f32 temps
    per_row = n * (2 * (jnp.dtype(jnp.float32).itemsize + 4 + out_bytes) + 6 * 4)
    budget = 12 * 1024 * 1024
    tr = budget // max(per_row, 1)
    tr = max(8, min(int(tr), 2048))
    tr = (tr // 8) * 8
    r_pad = ((r + 7) // 8) * 8
    tr = min(tr, r_pad)
    # Prefer >=2 grid steps for megacore sharding when there is enough work.
    if tr >= r_pad and r_pad >= 512:
        tr = ((r_pad // 2 + 7) // 8) * 8
    return max(8, tr)


def gumbel_softmax(logits, key, *, temperature=1.0, hard=True, block_rows=None):
    """Pallas Gumbel-Softmax. `logits`: any shape, softmax over the last axis.

    `key` is a jax PRNG key used for the uniform noise (torch.rand equivalent).
    """
    orig_shape = logits.shape
    n = orig_shape[-1]
    x2d = logits.reshape(-1, n)
    r = x2d.shape[0]

    # Uniform noise in [0, 1), same role as torch.rand(logits.size()).
    u = jax.random.uniform(key, (r, n), dtype=jnp.float32)

    tr = _choose_block_rows(r, n, logits.dtype) if block_rows is None else block_rows
    grid = (pl.cdiv(r, tr),)

    kernel = functools.partial(
        _gumbel_softmax_kernel, temperature=float(temperature), hard=bool(hard)
    )

    out = pl.pallas_call(
        kernel,
        out_shape=jax.ShapeDtypeStruct((r, n), logits.dtype),
        grid=grid,
        in_specs=[
            pl.BlockSpec((tr, n), lambda i: (i, 0)),
            pl.BlockSpec((tr, n), lambda i: (i, 0)),
        ],
        out_specs=pl.BlockSpec((tr, n), lambda i: (i, 0)),
        compiler_params=pltpu.CompilerParams(
            dimension_semantics=("parallel",),
            vmem_limit_bytes=32 * 1024 * 1024,
        ),
    )(x2d, u)

    return out.reshape(orig_shape)


if __name__ == "__main__":
    # small shapes consistent with the module: (batch=2, seq=8, classes=32)
    B, S, N = 2, 8, 32
    root = jax.random.PRNGKey(0)
    logits_key, noise_key = jax.random.split(root)
    logits = jax.random.normal(logits_key, (B, S, N), jnp.float32)

    fwd_hard = jax.jit(functools.partial(gumbel_softmax, temperature=1.0, hard=True))
    fwd_soft = jax.jit(functools.partial(gumbel_softmax, temperature=1.0, hard=False))

    y_hard = jax.block_until_ready(fwd_hard(logits, noise_key))
    y_soft = jax.block_until_ready(fwd_soft(logits, noise_key))

    assert y_hard.shape == (B, S, N) and y_hard.dtype == jnp.float32
    assert y_soft.shape == (B, S, N) and y_soft.dtype == jnp.float32

    # pure-JAX reference (same noise stream as the wrapper draws)
    u_ref = jax.random.uniform(noise_key, (B * S, N), dtype=jnp.float32)
    g_ref = -jnp.log(-jnp.log(u_ref + _EPS) + _EPS)
    ref_soft = jax.nn.softmax(logits.reshape(-1, N) + g_ref, axis=-1).reshape(B, S, N)

    assert bool(jnp.max(jnp.abs(y_soft - ref_soft)) < 1e-5)
    assert bool(jnp.all(jnp.argmax(y_hard, -1) == jnp.argmax(ref_soft, -1)))

    # sanity: both variants are (approximately) row-stochastic, hard is ~one-hot
    assert bool(jnp.all(jnp.abs(jnp.sum(y_hard, axis=-1) - 1.0) < 1e-3))
    assert bool(jnp.all(jnp.abs(jnp.sum(y_soft, axis=-1) - 1.0) < 1e-3))
    assert bool(jnp.all(jnp.abs(jnp.max(y_hard, axis=-1) - 1.0) < 1e-3))
    assert bool(jnp.all(jnp.isfinite(y_hard)))
    assert bool(jnp.all(jnp.isfinite(y_soft)))

    print("KERNEL_OK")
</pallas_src>

<mosaic_0001>
module attributes {stable_mosaic.version = 11 : i64} {
  func.func @_gumbel_softmax_kernel(%arg0: i32, %arg1: memref<16x32xf32, #tpu.memory_space<vmem>>, %arg2: memref<16x32xf32, #tpu.memory_space<vmem>>, %arg3: memref<16x32xf32, #tpu.memory_space<vmem>>) attributes {dimension_semantics = [#tpu.dimension_semantics<parallel>], iteration_bounds = array<i64: 1>, scalar_prefetch = 0 : i64, scratch_operands = 0 : i64, tpu.core_type = #tpu.core_type<tc>, window_params = [{transform_indices = @transform_0, window_bounds = array<i64: 16, 32>}, {transform_indices = @transform_1, window_bounds = array<i64: 16, 32>}, {transform_indices = @transform_2, window_bounds = array<i64: 16, 32>}]} {
    %c0 = arith.constant 0 : index
    %c0_0 = arith.constant 0 : index
    %0 = vector.load %arg1[%c0, %c0_0] : memref<16x32xf32, #tpu.memory_space<vmem>>, vector<16x32xf32>
    %c0_1 = arith.constant 0 : index
    %c0_2 = arith.constant 0 : index
    %1 = vector.load %arg2[%c0_1, %c0_2] : memref<16x32xf32, #tpu.memory_space<vmem>>, vector<16x32xf32>
    %cst = arith.constant 9.99999968E-21 : f32
    %2 = vector.broadcast %cst : f32 to vector<16x32xf32>
    %3 = arith.addf %1, %2 : vector<16x32xf32>
    %4 = math.log %3 : vector<16x32xf32>
    %cst_3 = arith.constant 0.000000e+00 : f32
    %5 = vector.broadcast %cst_3 : f32 to vector<16x32xf32>
    %6 = arith.subf %5, %4 : vector<16x32xf32>
    %cst_4 = arith.constant 9.99999968E-21 : f32
    %7 = vector.broadcast %cst_4 : f32 to vector<16x32xf32>
    %8 = arith.addf %6, %7 : vector<16x32xf32>
    %9 = math.log %8 : vector<16x32xf32>
    %cst_5 = arith.constant 0.000000e+00 : f32
    %10 = vector.broadcast %cst_5 : f32 to vector<16x32xf32>
    %11 = arith.subf %10, %9 : vector<16x32xf32>
    %12 = arith.addf %0, %11 : vector<16x32xf32>
    %cst_6 = arith.constant 1.000000e+00 : f32
    %13 = vector.broadcast %cst_6 : f32 to vector<16x32xf32>
    %14 = arith.mulf %12, %13 : vector<16x32xf32>
    %cst_7 = arith.constant dense<0xFF800000> : vector<16xf32>
    %15 = vector.multi_reduction <maximumf>, %14, %cst_7 [1] : vector<16x32xf32> to vector<16xf32>
    %16 = vector.shape_cast %15 : vector<16xf32> to vector<16x1xf32>
    %17 = vector.broadcast %16 : vector<16x1xf32> to vector<16x32xf32>
    %18 = arith.subf %14, %17 : vector<16x32xf32>
    %19 = math.exp %18 : vector<16x32xf32>
    %cst_8 = arith.constant dense<0.000000e+00> : vector<16xf32>
    %20 = vector.multi_reduction <add>, %19, %cst_8 [1] : vector<16x32xf32> to vector<16xf32>
    %21 = vector.shape_cast %20 : vector<16xf32> to vector<16x1xf32>
    %cst_9 = arith.constant 1.000000e+00 : f32
    %22 = vector.broadcast %cst_9 : f32 to vector<16x1xf32>
    %23 = arith.divf %22, %21 : vector<16x1xf32>
    %24 = vector.broadcast %23 : vector<16x1xf32> to vector<16x32xf32>
    %25 = arith.mulf %19, %24 : vector<16x32xf32>
    %26 = tpu.iota {dimensions = array<i32: 1>} : vector<16x32xi32>
    %27 = vector.broadcast %16 : vector<16x1xf32> to vector<16x32xf32>
    %28 = arith.cmpf oeq, %14, %27 : vector<16x32xf32>
    %c32_i32 = arith.constant 32 : i32
    %29 = vector.broadcast %c32_i32 : i32 to vector<16x32xi32>
    %30 = arith.select %28, %26, %29 : vector<16x32xi1>, vector<16x32xi32>
    %cst_10 = arith.constant dense<2147483647> : vector<16xi32>
    %31 = vector.multi_reduction <minsi>, %30, %cst_10 [1] : vector<16x32xi32> to vector<16xi32>
    %32 = vector.shape_cast %31 : vector<16xi32> to vector<16x1xi32>
    %33 = vector.broadcast %32 : vector<16x1xi32> to vector<16x32xi32>
    %34 = arith.cmpi eq, %26, %33 : vector<16x32xi32>
    %35 = arith.extui %34 : vector<16x32xi1> to vector<16x32xi32>
    %36 = arith.sitofp %35 : vector<16x32xi32> to vector<16x32xf32>
    %37 = arith.subf %36, %25 : vector<16x32xf32>
    %38 = arith.addf %37, %25 : vector<16x32xf32>
    %c0_11 = arith.constant 0 : index
    %c0_12 = arith.constant 0 : index
    %39 = vector.load %arg3[%c0_11, %c0_12] : memref<16x32xf32, #tpu.memory_space<vmem>>, vector<16x32xf32>
    tpu.vector_store %arg3[%c0_11, %c0_12], %38 {strides = array<i32>} : memref<16x32xf32, #tpu.memory_space<vmem>>, vector<16x32xf32>,
    return
  }
  func.func @transform_0(%arg0: i32) -> (i32, i32) {
    %c0_i32 = arith.constant 0 : i32
    %c0_i32_0 = arith.constant 0 : i32
    return %arg0, %c0_i32 : i32, i32
  }
  func.func @transform_1(%arg0: i32) -> (i32, i32) {
    %c0_i32 = arith.constant 0 : i32
    %c0_i32_0 = arith.constant 0 : i32
    return %arg0, %c0_i32 : i32, i32
  }
  func.func @transform_2(%arg0: i32) -> (i32, i32) {
    %c0_i32 = arith.constant 0 : i32
    %c0_i32_0 = arith.constant 0 : i32
    return %arg0, %c0_i32 : i32, i32
  }
}

</mosaic_0001>

<bundles_post_ra>
// kernel: gumbel_softmax.1
= control target key start
LH: loop header
LB: loop body
LE: loop exit
PB: predicated region body
PF: predicated region fallthrough
CT: control target
= control target key end

     0   :  { %s251_s0 = inlined_call_operand.vmem [shape: f32[16,32], index: 0, kind: input, shape index: {}]   ;;  %s252_s1 = inlined_call_operand.vmem [shape: f32[16,32], index: 1, kind: input, shape index: {}]   ;;  %s253_s2 = inlined_call_operand.hbm [shape: f32[16,32], index: 2, kind: output, shape index: {}]  }
   0x1   :  { %v14_v0 = vld [vmem:[%s252_s1] sm:$0xff]  ;;  %v15_v2 = vld [vmem:[%s252_s1 + $0x8] sm:$0xff] }
   0x2   :  { %v16_v1 = vadd.f32 1e-20, %v14_v0 }
   0x3   :  { %7 = vsyncpa [#allocation3], 0  ;;  %v17_v3 = vadd.f32 1e-20, %v15_v2  ;;  %v12_v15 = vld [vmem:[%s251_s0] sm:$0xff]  ;;  %vm34_vm0 = vcmask 261120   ;;  %v85_v24 = vlaneseq }
   0x4   :  { %157 = vlog2.f32 %v16_v1  ;;  %v13_v20 = vld [vmem:[%s251_s0 + $0x8] sm:$0xff]  ;;  %s200_s0 = smov [#allocation2]   ;;  %s139_s19 = sshll.u32 %s253_s2, 4  ;;  %s140_s19 = int_to_ptr.hbm [resolvable:$true] %s139_s19 }
   0x5   :  { %159 = vlog2.f32 %v17_v3  ;;  %v232_v25 = vand.u32 127, %v85_v24  ;;  %s137_s16 = sshll.u32 %s200_s0, 4  ;;  %s201_s20 = smov 128   ;;  %s138_s16 = int_to_ptr.vmem [resolvable:$true] %s137_s16 }
   0x6   :  { %s202_s21 = smov 8  }
   0xa   :  { %v158_v4 = vpop.eup %157 }
   0xb   :  { %v160_v5 = vpop.eup %159  ;;  %v19_v6 = vmul.f32 0.6931472, %v158_v4 }
   0xc   :  { %v21_v7 = vmul.f32 0.6931472, %v160_v5 }
   0xd   :  { %v22_v8 = vsub.f32 0.0, %v19_v6 }
   0xe   :  { %v23_v9 = vsub.f32 0.0, %v21_v7 }
   0xf   :  { %v24_v10 = vadd.f32 1e-20, %v22_v8 }
  0x10   :  { %v25_v11 = vadd.f32 1e-20, %v23_v9 }
  0x11   :  { %161 = vlog2.f32 %v24_v10 }
  0x12   :  { %163 = vlog2.f32 %v25_v11 }
  0x17   :  { %v162_v12 = vpop.eup %161 }
  0x18   :  { %v164_v13 = vpop.eup %163  ;;  %v27_v14 = vmul.f32 0.6931472, %v162_v12 }
  0x19   :  { %v29_v16 = vmul.f32 0.6931472, %v164_v13 }
  0x1a   :  { %v30_v17 = vsub.f32 0.0, %v27_v14  ;;  %v199_v14 = vmov 0.0  }
  0x1b   :  { %v31_v19 = vsub.f32 0.0, %v29_v16 }
  0x1c   :  { %v32_v18 = vadd.f32 %v30_v17, %v12_v15 }
  0x1d   :  { %v33_v22 = vadd.f32 %v31_v19, %v13_v20 }
  0x1e   :  { %v35_v21 = vsel %vm34_vm0, %v32_v18, -inf }
  0x1f   :  { %36 = vmax.xlane.f32.xlu0 %v35_v21  ;;  %v38_v23 = vsel %vm34_vm0, %v33_v22, -inf }
  0x27   :  { %39 = vmax.xlane.f32.xlu0 %v38_v23 }
  0x92   :  { %v37_v26 = vpop.xlane.xlu0 %36 }
  0x93   :  { %v41_v27 = vsub.f32 %v32_v18, %v37_v26  ;;  %vm87_vm1 = vcmp.eq.f32.partialorder %v32_v18, %v37_v26 }
  0x94   :  { %v89_v28 = vsel %vm87_vm1, %v232_v25, 32 }
  0x95   :  { %v43_v29 = vmul.f32 1.442695, %v41_v27  ;;  %v91_v30 = vsel %vm34_vm0, %v89_v28, 2147483647 }
  0x96   :  { %v93_v31 = vshra.s32 %v91_v30, 16  ;;  %v92_v44 = vand.u32 65535, %v91_v30 }
  0x97   :  { %165 = vpow2.f32 %v43_v29 }
  0x98   :  { %v95_v32 = vcvt.s32.f32 %v93_v31  ;;  %v94_v46 = vcvt.s32.f32 %v92_v44 }
  0x9a   :  { %96 = vmin.xlane.f32.xlu1 %v95_v32  ;;  %v40_v33 = vpop.xlane.xlu0 %39 }
  0x9b   :  { %v42_v34 = vsub.f32 %v33_v22, %v40_v33  ;;  %vm88_vm2 = vcmp.eq.f32.partialorder %v33_v22, %v40_v33 }
  0x9c   :  { %v90_v35 = vsel %vm88_vm2, %v232_v25, 32 }
  0x9d   :  { %v166_v36 = vpop.eup %165  ;;  %v45_v37 = vmul.f32 1.442695, %v42_v34  ;;  %v106_v38 = vsel %vm34_vm0, %v90_v35, 2147483647 }
  0x9e   :  { %v47_v39 = vsel %vm34_vm0, %v166_v36, 0.0  ;;  %v108_v40 = vshra.s32 %v106_v38, 16  ;;  %v107_v48 = vand.u32 65535, %v106_v38 }
  0x9f   :  { %167 = vpow2.f32 %v45_v37  ;;  %48 = vadd.xlane.f32.xlu2 %v47_v39 }
  0xa0   :  { %v110_v41 = vcvt.s32.f32 %v108_v40  ;;  %v109_v50 = vcvt.s32.f32 %v107_v48 }
  0xa2   :  { %111 = vmin.xlane.f32.xlu1 %v110_v41 }
  0xa5   :  { %v239_v42 = vpop.eup %167 }
  0xa6   :  { %v50_v43 = vsel %vm34_vm0, %v239_v42, 0.0 }
  0xa7   :  { %51 = vadd.xlane.f32.xlu2 %v50_v43 }
 0x10d   :  { %v97_v45 = vpop.xlane.xlu1 %96 }
 0x10e   :  { %vm98_vm3 = vcmp.eq.f32.partialorder %v95_v32, %v97_v45  ;;  %v103_v63 = vcvt.f32.s32 %v97_v45 }
 0x10f   :  { %v99_v47 = vsel %vm98_vm3, %v94_v46, inf }
 0x110   :  { %100 = vmin.xlane.f32.xlu0 %v99_v47  ;;  %v104_v5 = vshll.u32 %v103_v63, 16 }
 0x112   :  { %v49_v52 = vpop.xlane.xlu2 %48 }
 0x113   :  { %169 = vrcp.f32 %v49_v52  ;;  %v64_v62 = vand.u32 2147483648, %v49_v52  ;;  %vm58_vm6 = vweird.f32 %v49_v52  ;;  %v62_v0 = vand.u32 2147483647, %v49_v52 }
 0x115   :  { %v112_v49 = vpop.xlane.xlu1 %111  ;;  %v65_v3 = vor.u32 1.1754944e-38, %v64_v62  ;;  %vm63_vm8 = vcmp.eq.f32.partialorder %v62_v0, 8.507059e+37 }
 0x116   :  { %vm113_vm4 = vcmp.eq.f32.partialorder %v110_v41, %v112_v49  ;;  %v118_v10 = vcvt.f32.s32 %v112_v49 }
 0x117   :  { %v114_v51 = vsel %vm113_vm4, %v109_v50, inf }
 0x118   :  { %115 = vmin.xlane.f32.xlu1 %v114_v51  ;;  %v119_v20 = vshll.u32 %v118_v10, 16 }
 0x119   :  { %v170_v54 = vpop.eup %169 }
 0x11a   :  { %v52_v53 = vpop.xlane.xlu2 %51  ;;  %v54_v55 = vmul.f32 %v170_v54, %v49_v52  ;;  %vm59_vm5 = vweird.f32 %v170_v54 }
 0x11b   :  { %171 = vrcp.f32 %v52_v53  ;;  %vm60_vm7 = vmor %vm58_vm6, %vm59_vm5  ;;  %v79_v11 = vand.u32 2147483648, %v52_v53  ;;  %vm73_vm10 = vweird.f32 %v52_v53  ;;  %v77_v12 = vand.u32 2147483647, %v52_v53 }
 0x11c   :  { %v55_v56 = vsub.f32 1.0, %v54_v55 }
 0x11d   :  { %v80_v18 = vor.u32 1.1754944e-38, %v79_v11  ;;  %vm78_vm13 = vcmp.eq.f32.partialorder %v77_v12, 8.507059e+37 }
 0x11e   :  { %v56_v58 = vmul.f32 %v170_v54, %v55_v56 }
 0x120   :  { %v57_v60 = vadd.f32 %v170_v54, %v56_v58 }
 0x121   :  { %v172_v57 = vpop.eup %171 }
 0x122   :  { %v69_v59 = vmul.f32 %v172_v57, %v52_v53  ;;  %v61_v2 = vsel %vm60_vm7, %v170_v54, %v57_v60  ;;  %vm74_vm9 = vweird.f32 %v172_v57 }
 0x123   :  { %v66_v7 = vsel %vm63_vm8, %v65_v3, %v61_v2  ;;  %vm75_vm12 = vmor %vm73_vm10, %vm74_vm9 }
 0x124   :  { %v70_v61 = vsub.f32 1.0, %v69_v59  ;;  %v83_v13 = vmul.f32 %v166_v36, %v66_v7 }
 0x126   :  { %v71_v1 = vmul.f32 %v172_v57, %v70_v61 }
 0x128   :  { %v72_v8 = vadd.f32 %v172_v57, %v71_v1 }
 0x12a   :  { %v76_v16 = vsel %vm75_vm12, %v172_v57, %v72_v8 }
 0x12b   :  { %v81_v23 = vsel %vm78_vm13, %v80_v18, %v76_v16 }
 0x12c   :  { %v84_v26 = vmul.f32 %v239_v42, %v81_v23 }
 0x183   :  { %v101_v4 = vpop.xlane.xlu0 %100 }
 0x184   :  { %v102_v6 = vcvt.f32.s32 %v101_v4 }
 0x186   :  { %v105_v9 = vadd.s32 %v104_v5, %v102_v6 }
 0x188   :  { %vm121_vm11 = vcmp.eq.s32.totalorder %v232_v25, %v105_v9 }
 0x189   :  { %v151_v15 = vsel %vm121_vm11, 1.0, %v199_v14 }
 0x18a   :  { %v127_v17 = vsub.f32 %v151_v15, %v83_v13 }
 0x18b   :  { %v116_v19 = vpop.xlane.xlu1 %115 }
 0x18c   :  { %v129_v21 = vadd.f32 %v127_v17, %v83_v13  ;;  %v117_v22 = vcvt.f32.s32 %v116_v19 }
 0x18e   :  { %131 = vst.msk [vmem:[#allocation2] sm:$0xff] %vm34_vm0, %v129_v21  ;;  %v120_v24 = vadd.s32 %v119_v20, %v117_v22 }
 0x190   :  { %vm122_vm14 = vcmp.eq.s32.totalorder %v232_v25, %v120_v24 }
 0x191   :  { %v152_v27 = vsel %vm122_vm14, 1.0, %v199_v14 }
 0x192   :  { %v128_v28 = vsub.f32 %v152_v27, %v84_v26 }
 0x194   :  { %v130_v29 = vadd.f32 %v128_v28, %v84_v26 }
 0x196   :  { %132 = vst.msk [vmem:[#allocation2 + $0x8] sm:$0xff] %vm34_vm0, %v130_v29 }
 0x197   :  { %145 = dma.vmem_to_hbm [thread:$0]  %s138_s16, 256, %s140_s19, [#allocation3], %s201_s20, %s201_s20, %s202_s21  }
 0x198   :  { %197 = dma.done.wait [#allocation3], 256  }
 0x199   :  { %198 = vsyncadd [#allocation3], 4294967040 }
 0x19a   :  { %150 = vsyncpa [#allocation3], 1 }

</bundles_post_ra>
